<compile_context>
chip_gen: v6e
topology: v6e:2x2x1
jax: 0.10.0
libtpu: 0.0.40
codegen_flags: <defaults>
</compile_context>

<pallas_src>
import math

import numpy as np
import jax
import jax.numpy as jnp
from jax.experimental import pallas as pl
from jax.experimental.pallas import tpu as pltpu


def _cdiv(a, b):
    return -(-a // b)


def _round_up(a, b):
    return _cdiv(a, b) * b


def _choose_packing(d_model):
    """Pick P rows per 128-lane output slab so the last dim is lane-dense."""
    if d_model % 128 == 0:
        return 1, d_model                       # already lane-dense
    pd = (d_model * 128) // math.gcd(d_model, 128)   # lcm(d_model, 128)
    if pd <= 8192:                              # keep the slab a sane width
        return pd // d_model, pd
    # TODO(synk): pathological d_model (huge lcm with 128) falls back to a
    # lane-sparse output block with masked stores.
    return 1, d_model


def _num_emb_kernel(code_ref, lut_ref, out_ref):
    # code_ref : (1, TN_p, PD) int8  per-lane broadcast code in {0, 1, 2}
    # lut_ref  : (1, 3, PD)    f32   final per-code output vectors, tiled P times
    # out_ref  : (1, TN_p, PD)       lane-packed output (P original rows / slab)
    c = code_ref[0].astype(jnp.int32)            # explicit unpack: cheap + safe
    lut = lut_ref[0]                             # (3, PD)
    l0 = lut[0:1, :]
    l1 = lut[1:2, :]
    l2 = lut[2:3, :]
    out = jnp.where(c == 0, l0, jnp.where(c == 1, l1, l2))   # (TN_p, PD)
    out_ref[0] = out.astype(out_ref.dtype)


def init_params(key, d_model, max_depths):
    """Deterministic synthetic init matching the module's parameter shapes."""
    ds = [int(math.ceil(m ** 0.5) + 1) for m in max_depths]
    V = len(max_depths)
    D_pad = max(8, _round_up(max(ds), 8))

    tables = jnp.zeros((V, 3, D_pad), jnp.float32)
    W = jnp.zeros((V, D_pad, d_model), jnp.float32)
    b = jnp.zeros((V, d_model), jnp.float32)

    key, kg, kb = jax.random.split(key, 3)
    # Slightly perturbed affine params so the LayerNorm affine path is exercised.
    gamma = 1.0 + 0.1 * jax.random.normal(kg, (V, d_model), jnp.float32)
    beta = 0.1 * jax.random.normal(kb, (V, d_model), jnp.float32)

    for i, d in enumerate(ds):
        key, k1, k2, k3 = jax.random.split(key, 4)
        tab_i = jax.random.normal(k1, (3, d), jnp.float32)       # nn.Embedding ~ N(0,1)
        bound = 1.0 / math.sqrt(d)
        w_i = jax.random.uniform(k2, (d, d_model), jnp.float32, -bound, bound)
        b_i = jax.random.uniform(k3, (d_model,), jnp.float32, -bound, bound)
        tables = tables.at[i, :, :d].set(tab_i)
        W = W.at[i, :d, :].set(w_i)
        b = b.at[i].set(b_i)

    return dict(tables=tables, W=W, b=b, gamma=gamma, beta=beta)


def _final_lut(params):
    """(V, 3, d_model) LUT of the final module output for codes {0, 1, pad}."""
    tables, W, b = params["tables"], params["W"], params["b"]
    gamma, beta = params["gamma"], params["beta"]
    emb = jnp.stack(
        [tables[:, 0, :], tables[:, 1, :], jnp.zeros_like(tables[:, 0, :])],
        axis=1)                                               # (V, 3, D_pad)
    y = jnp.einsum("vcd,vdm->vcm", emb, W) + b[:, None, :]    # (V, 3, d_model)
    mu = jnp.mean(y, axis=-1, keepdims=True)
    var = jnp.mean(jnp.square(y - mu), axis=-1, keepdims=True)
    yn = (y - mu) * jax.lax.rsqrt(var + 1e-5)                 # eps = 1e-5 (PyTorch default)
    return yn * gamma[:, None, :] + beta[:, None, :]


def numerical_embedding_forward(x, params, *, row_tile_packed=2048,
                                out_dtype=jnp.float32):
    """x: (batch, num_vars, seq) int32 -> (num_vars, batch, seq, d_model)."""
    B, V, S = x.shape
    d_model = params["W"].shape[-1]
    N = B * S

    P, PD = _choose_packing(d_model)

    # Tiny per-variable fold of Embedding + Linear + LayerNorm (plain JAX).
    lut = _final_lut(params).astype(jnp.float32)              # (V, 3, d_model)
    if P > 1:
        lut = jnp.tile(lut, (1, 1, P))                        # (V, 3, PD)

    # Classify tokens -> code {0: tok==0, 1: 1<=tok<=254, 2: pad >= 255}.
    # Negative (invalid) tokens are clamped to 0 (PyTorch would error on them).
    tok = jnp.transpose(x, (1, 0, 2)).reshape(V, N)           # (V, N) int32
    code = jnp.where(tok >= 255, 2, jnp.clip(tok, 0, 1)).astype(jnp.int8)

    # Pad only up to a multiple of P (lane packing), not to a tile multiple.
    N_pad = _round_up(N, P)
    if N_pad != N:
        code = jnp.pad(code, ((0, 0), (0, N_pad - N)), constant_values=2)
    N_p = N_pad // P

    # Pre-broadcast codes to the lane-dense output layout (int8, fused by XLA).
    codeb = jnp.broadcast_to(code[:, :, None], (V, N_pad, d_model))
    codeb = codeb.reshape(V, N_p, PD)

    # Tile the packed-row axis.  row_tile_packed=2048 -> ~1 MiB f32 out slab.
    TN_p = N_p if N_p <= row_tile_packed else row_tile_packed
    grid = (V, pl.cdiv(N_p, TN_p))                            # ragged last block OK

    out = pl.pallas_call(
        _num_emb_kernel,
        out_shape=jax.ShapeDtypeStruct((V, N_p, PD), out_dtype),
        grid_spec=pltpu.PrefetchScalarGridSpec(
            num_scalar_prefetch=0,
            grid=grid,
            in_specs=[
                pl.BlockSpec((1, TN_p, PD), lambda v, r: (v, r, 0)),   # codes
                pl.BlockSpec((1, 3, PD), lambda v, r: (v, 0, 0)),      # LUT
            ],
            out_specs=pl.BlockSpec((1, TN_p, PD), lambda v, r: (v, r, 0)),
        ),
        compiler_params=pltpu.CompilerParams(
            dimension_semantics=("parallel", "parallel")),
    )(codeb, lut)

    # Free row-major un-pack; slice only if N wasn't a multiple of P.
    out = out.reshape(V, N_pad, d_model)
    if N_pad != N:
        out = out[:, :N, :]
    return out.reshape(V, B, S, d_model)


def reference_forward(x, params):
    """Pure-JAX replica of the PyTorch forward, for correctness checking."""
    B, V, S = x.shape
    outs = []
    for i in range(V):
        xi = x[:, i, :]
        mask = (xi < 255).astype(jnp.float32)[..., None]
        xc = jnp.minimum(xi, 1)
        e = params["tables"][i][xc] * mask                    # (B, S, D_pad)
        y = e @ params["W"][i] + params["b"][i]
        mu = y.mean(-1, keepdims=True)
        var = ((y - mu) ** 2).mean(-1, keepdims=True)
        y = (y - mu) / jnp.sqrt(var + 1e-5)
        y = y * params["gamma"][i] + params["beta"][i]
        outs.append(y)
    return jnp.stack(outs)                                    # (V, B, S, d_model)


if __name__ == "__main__":
    d_model = 32
    max_depths = [16, 9, 25, 4]      # -> per-variable emb dims d_i = 5, 4, 6, 3
    batch, seq = 2, 8
    V = len(max_depths)

    key = jax.random.PRNGKey(0)
    key, kp, kx, km = jax.random.split(key, 4)
    params = init_params(kp, d_model, max_depths)

    # Tokens in {0..3} with some padding positions set to 255.
    x_bits = jax.random.randint(kx, (batch, V, seq), 0, 4, dtype=jnp.int32)
    pad = jax.random.uniform(km, (batch, V, seq)) < 0.25
    x = jnp.where(pad, jnp.int32(255), x_bits)

    fwd = jax.jit(numerical_embedding_forward)
    out = jax.block_until_ready(fwd(x, params))
    ref = reference_forward(x, params)
    np.testing.assert_allclose(np.asarray(out), np.asarray(ref), rtol=1e-4, atol=1e-4)
    assert out.shape == (V, batch, seq, d_model)

    # Second, shape that exercises the N % P != 0 pad/slice path.
    key, kx2, km2 = jax.random.split(key, 3)
    b2, s2 = 3, 7
    x2_bits = jax.random.randint(kx2, (b2, V, s2), 0, 4, dtype=jnp.int32)
    pad2 = jax.random.uniform(km2, (b2, V, s2)) < 0.25
    x2 = jnp.where(pad2, jnp.int32(255), x2_bits)
    out2 = jax.block_until_ready(jax.jit(numerical_embedding_forward)(x2, params))
    ref2 = reference_forward(x2, params)
    np.testing.assert_allclose(np.asarray(out2), np.asarray(ref2), rtol=1e-4, atol=1e-4)
    assert out2.shape == (V, b2, s2, d_model)

    print("KERNEL_OK")
</pallas_src>

<mosaic_0001>
module attributes {stable_mosaic.version = 11 : i64} {
  func.func @_num_emb_kernel(%arg0: i32, %arg1: i32, %arg2: memref<1x4x128xi8, #tpu.memory_space<vmem>>, %arg3: memref<1x3x128xf32, #tpu.memory_space<vmem>>, %arg4: memref<1x4x128xf32, #tpu.memory_space<vmem>>) attributes {dimension_semantics = [#tpu.dimension_semantics<parallel>, #tpu.dimension_semantics<parallel>], iteration_bounds = array<i64: 4, 1>, scalar_prefetch = 0 : i64, scratch_operands = 0 : i64, tpu.core_type = #tpu.core_type<tc>, window_params = [{transform_indices = @transform_0, window_bounds = array<i64: 1, 4, 128>}, {transform_indices = @transform_1, window_bounds = array<i64: 1, 3, 128>}, {transform_indices = @transform_2, window_bounds = array<i64: 1, 4, 128>}]} {
    %c0 = arith.constant 0 : index
    %c0_0 = arith.constant 0 : index
    %c0_1 = arith.constant 0 : index
    %0 = vector.load %arg2[%c0, %c0_0, %c0_1] : memref<1x4x128xi8, #tpu.memory_space<vmem>>, vector<1x4x128xi8>
    %1 = vector.shape_cast %0 : vector<1x4x128xi8> to vector<4x128xi8>
    %2 = arith.extsi %1 : vector<4x128xi8> to vector<4x128xi32>
    %c0_2 = arith.constant 0 : index
    %c0_3 = arith.constant 0 : index
    %c0_4 = arith.constant 0 : index
    %3 = vector.load %arg3[%c0_2, %c0_3, %c0_4] : memref<1x3x128xf32, #tpu.memory_space<vmem>>, vector<1x3x128xf32>
    %4 = vector.shape_cast %3 : vector<1x3x128xf32> to vector<3x128xf32>
    %5 = vector.extract_strided_slice %4 {offsets = [0, 0], sizes = [1, 128], strides = [1, 1]} : vector<3x128xf32> to vector<1x128xf32>
    %6 = vector.extract_strided_slice %4 {offsets = [1, 0], sizes = [1, 128], strides = [1, 1]} : vector<3x128xf32> to vector<1x128xf32>
    %7 = vector.extract_strided_slice %4 {offsets = [2, 0], sizes = [1, 128], strides = [1, 1]} : vector<3x128xf32> to vector<1x128xf32>
    %c0_i32 = arith.constant 0 : i32
    %8 = vector.broadcast %c0_i32 : i32 to vector<4x128xi32>
    %9 = arith.cmpi eq, %2, %8 : vector<4x128xi32>
    %c1_i32 = arith.constant 1 : i32
    %10 = vector.broadcast %c1_i32 : i32 to vector<4x128xi32>
    %11 = arith.cmpi eq, %2, %10 : vector<4x128xi32>
    %12 = vector.shape_cast %6 : vector<1x128xf32> to vector<1x128xf32>
    %13 = vector.broadcast %12 : vector<1x128xf32> to vector<4x128xf32>
    %14 = vector.shape_cast %7 : vector<1x128xf32> to vector<1x128xf32>
    %15 = vector.broadcast %14 : vector<1x128xf32> to vector<4x128xf32>
    %16 = arith.select %11, %13, %15 : vector<4x128xi1>, vector<4x128xf32>
    %17 = vector.shape_cast %5 : vector<1x128xf32> to vector<1x128xf32>
    %18 = vector.broadcast %17 : vector<1x128xf32> to vector<4x128xf32>
    %19 = arith.select %9, %18, %16 : vector<4x128xi1>, vector<4x128xf32>
    %c0_5 = arith.constant 0 : index
    %c0_6 = arith.constant 0 : index
    %c0_7 = arith.constant 0 : index
    %20 = vector.load %arg4[%c0_5, %c0_6, %c0_7] : memref<1x4x128xf32, #tpu.memory_space<vmem>>, vector<1x4x128xf32>
    %21 = vector.shape_cast %20 : vector<1x4x128xf32> to vector<4x128xf32>
    %22 = vector.shape_cast %19 : vector<4x128xf32> to vector<1x4x128xf32>
    tpu.vector_store %arg4[%c0_5, %c0_6, %c0_7], %22 {strides = array<i32>} : memref<1x4x128xf32, #tpu.memory_space<vmem>>, vector<1x4x128xf32>,
    return
  }
  func.func @transform_0(%arg0: i32, %arg1: i32) -> (i32, i32, i32) {
    %c0_i32 = arith.constant 0 : i32
    %c0_i32_0 = arith.constant 0 : i32
    return %arg0, %arg1, %c0_i32 : i32, i32, i32
  }
  func.func @transform_1(%arg0: i32, %arg1: i32) -> (i32, i32, i32) {
    %c0_i32 = arith.constant 0 : i32
    %c0_i32_0 = arith.constant 0 : i32
    %c0_i32_1 = arith.constant 0 : i32
    return %arg0, %c0_i32, %c0_i32_0 : i32, i32, i32
  }
  func.func @transform_2(%arg0: i32, %arg1: i32) -> (i32, i32, i32) {
    %c0_i32 = arith.constant 0 : i32
    %c0_i32_0 = arith.constant 0 : i32
    return %arg0, %arg1, %c0_i32 : i32, i32, i32
  }
}

</mosaic_0001>

<bundles_post_ra>
// kernel: tile.9
= control target key start
LH: loop header
LB: loop body
LE: loop exit
PB: predicated region body
PF: predicated region fallthrough
CT: control target
= control target key end

     0   :  { %vm63_vm0 = vcmask 1047556   ;;  %s180_s30 = smov 96   ;;  %vm65_vm1 = vcmask 261120   ;;  %s181_s2 = smov 32   ;;  %vm82_vm2 = vcmask 1048320   ;;  %vm101_vm3 = vcmask 785920   ;;  %s244_s0 = inlined_call_operand.vmem [shape: f32[4,3,4,32], index: 0, kind: input, shape index: {}]   ;;  %s245_s1 = inlined_call_operand.vmem [shape: f32[4,3,128], index: 1, kind: output, shape index: {}]  }
   0x1   :  { %v163_v0 = vld [vmem:[%s244_s0 + $0x2c] sm:$0xf]  ;;  %v164_v1 = vld [vmem:[%s244_s0 + $0x28] sm:$0xf]  ;;  %v165_v2 = vld [vmem:[%s244_s0 + $0x24] sm:$0xf] }
   0x2   :  { %9 = vst [vmem:[#allocation1 + $0x58] sm:$0xf] %v163_v0  ;;  %14 = vst [vmem:[#allocation1 + $0x50] sm:$0xf] %v164_v1  ;;  %v166_v3 = vld [vmem:[%s244_s0 + $0x20] sm:$0xf] }
   0x3   :  { %19 = vst [vmem:[#allocation1 + $0x48] sm:$0xf] %v165_v2  ;;  %v167_v4 = vld [vmem:[%s244_s0 + $0x1c] sm:$0xf]  ;;  %24 = vst [vmem:[#allocation1 + $0x40] sm:$0xf] %v166_v3 }
   0x4   :  { %29 = vst [vmem:[#allocation1 + $0x38] sm:$0xf] %v167_v4  ;;  %v168_v5 = vld [vmem:[%s244_s0 + $0x18] sm:$0xf]  ;;  %v169_v6 = vld [vmem:[%s244_s0 + $0x14] sm:$0xf] }
   0x5   :  { %v170_v7 = vld [vmem:[%s244_s0 + $0x10] sm:$0xf]  ;;  %34 = vst [vmem:[#allocation1 + $0x30] sm:$0xf] %v168_v5  ;;  %39 = vst [vmem:[#allocation1 + $0x28] sm:$0xf] %v169_v6 }
   0x6   :  { %44 = vst [vmem:[#allocation1 + $0x20] sm:$0xf] %v170_v7  ;;  %v171_v8 = vld [vmem:[%s244_s0 + $0xc] sm:$0xf]  ;;  %v172_v9 = vld [vmem:[%s244_s0 + $0x8] sm:$0xf] }
   0x7   :  { %v173_v10 = vld [vmem:[%s244_s0 + $0x4] sm:$0xf]  ;;  %49 = vst [vmem:[#allocation1 + $0x18] sm:$0xf] %v171_v8  ;;  %54 = vst [vmem:[#allocation1 + $0x10] sm:$0xf] %v172_v9 }
   0x8   :  { %58 = vst [vmem:[#allocation1 + $0x8] sm:$0xf] %v173_v10  ;;  %v59_v11 = vld [vmem:[%s244_s0] sm:$0xf]  ;;  %s179_s0 = smov 64   ;;  %vm120_vm4 = vcmask 523520  }
   0x9   :  { %60 = vst [vmem:[#allocation1] sm:$0xf] %v59_v11 }
   0xa   :  { %v106_v12 = vld [vmem:[#allocation1 + $0x42] ss:$8 sm:$0xf]   ;;  %v87_v13 = vld [vmem:[#allocation1 + $0x43] ss:$8 sm:$0xf]  }
   0xb   :  { %107 = vrot.lane.b32.xlu1 %v106_v12, %s179_s0  ;;  %88 = vrot.lane.b32.xlu0 %v87_v13, %s180_s30  ;;  %v70_v22 = vld [vmem:[#allocation1 + $0x40] ss:$8 sm:$0xf]   ;;  %v125_v25 = vld [vmem:[#allocation1 + $0x41] ss:$8 sm:$0xf]  }
   0xc   :  { %73 = vst.msk [vmem:[#allocation0 + $0x10] sm:$0xf] %vm65_vm1, %v70_v22  }
   0xd   :  { %v96_v14 = vld [vmem:[#allocation1 + $0x2] ss:$8 sm:$0xf0]   ;;  %v77_v15 = vld [vmem:[#allocation1 + $0x3] ss:$8 sm:$0xf0]  }
   0xe   :  { %v115_v16 = vld [vmem:[#allocation1 + $0x1] ss:$8 sm:$0xf0]   ;;  %v62_v24 = vld [vmem:[#allocation1] ss:$8 sm:$0xf0]  }
  0x10   :  { %v94_v17 = vld [vmem:[#allocation1 + $0x2] ss:$8 sm:$0xf]   ;;  %v75_v18 = vld [vmem:[#allocation1 + $0x3] ss:$8 sm:$0xf]  }
  0x11   :  { %v98_v19 = vsel %vm63_vm0, %v96_v14, %v94_v17  ;;  %v79_v20 = vsel %vm63_vm0, %v77_v15, %v75_v18  ;;  %v113_v21 = vld [vmem:[#allocation1 + $0x1] ss:$8 sm:$0xf]   ;;  %v61_v23 = vld [vmem:[#allocation1] ss:$8 sm:$0xf]  }
  0x12   :  { %99 = vrot.lane.b32.xlu1 %v98_v19, %s179_s0  ;;  %80 = vrot.lane.b32.xlu0 %v79_v20, %s180_s30  ;;  %v117_v26 = vsel %vm63_vm0, %v115_v16, %v113_v21  ;;  %v64_v27 = vsel %vm63_vm0, %v62_v24, %v61_v23 }
  0x13   :  { %66 = vst.msk [vmem:[#allocation0] sm:$0xf] %vm65_vm1, %v64_v27   ;;  %68 = vst.msk [vmem:[#allocation0 + $0x4] sm:$0xf0] %vm65_vm1, %v64_v27  }
  0x16   :  { %126 = vrot.lane.b32.xlu1 %v125_v25, %s181_s2  ;;  %118 = vrot.lane.b32.xlu0 %v117_v26, %s181_s2 }
  0x7d   :  { %v108_v28 = vpop.permute.xlu1 %107   ;;  %v89_v29 = vpop.permute.xlu0 %88  }
  0x7e   :  { %92 = vst.msk [vmem:[#allocation0 + $0x10] sm:$0xf] %vm82_vm2, %v89_v29  }
  0x7f   :  { %111 = vst.msk [vmem:[#allocation0 + $0x10] sm:$0xf] %vm101_vm3, %v108_v28  }
  0x84   :  { %v100_v30 = vpop.permute.xlu1 %99   ;;  %v81_v31 = vpop.permute.xlu0 %80  }
  0x85   :  { %83 = vst.msk [vmem:[#allocation0] sm:$0xf] %vm82_vm2, %v81_v31   ;;  %85 = vst.msk [vmem:[#allocation0 + $0x4] sm:$0xf0] %vm82_vm2, %v81_v31  }
  0x86   :  { %102 = vst.msk [vmem:[#allocation0] sm:$0xf] %vm101_vm3, %v100_v30   ;;  %104 = vst.msk [vmem:[#allocation0 + $0x4] sm:$0xf0] %vm101_vm3, %v100_v30  }
  0x88   :  { %v127_v32 = vpop.permute.xlu1 %126   ;;  %v119_v33 = vpop.permute.xlu0 %118  }
  0x89   :  { %130 = vst.msk [vmem:[#allocation0 + $0x10] sm:$0xf] %vm120_vm4, %v127_v32   ;;  %121 = vst.msk [vmem:[#allocation0] sm:$0xf] %vm120_vm4, %v119_v33  }
  0x8a   :  { %123 = vst.msk [vmem:[#allocation0 + $0x4] sm:$0xf0] %vm120_vm4, %v119_v33  }
  0x90   :  { %v146_v34 = vld [vmem:[#allocation0 + $0x10] sm:$0xf]  ;;  %v135_v35 = vld [vmem:[#allocation0] sm:$0xf] }
  0x91   :  { %v140_v36 = vld [vmem:[#allocation0 + $0x8] sm:$0xf]  ;;  %175 = vst [vmem:[%s245_s1 + $0x8] sm:$0xf] %v146_v34  ;;  %138 = vst [vmem:[%s245_s1] sm:$0xf] %v135_v35 }
  0x92   :  { %174 = vst [vmem:[%s245_s1 + $0x4] sm:$0xf] %v140_v36 }

// kernel: numerical_embedding_forward.1
= control target key start
LH: loop header
LB: loop body
LE: loop exit
PB: predicated region body
PF: predicated region fallthrough
CT: control target
= control target key end

     0   :  { %s359_s9 = smov 0   ;;  %s361_s10 = smov 0   ;;  %s392_s0 = inlined_call_operand.vmem [shape: s8[4,4,128], index: 0, kind: input, shape index: {}]   ;;  %s393_s1 = inlined_call_operand.vmem [shape: f32[4,3,128], index: 1, kind: input, shape index: {}]   ;;  %s394_s2 = inlined_call_operand.vmem [shape: f32[4,4,128], index: 2, kind: output, shape index: {}]  }
   0x1   :  { %s363_s11 = smov 0  }
   0x2 LB: > { %s24_s12 = sadd.s32 1, %s338_s10  ;;  %p291_p0 = scmp.ge.s32.totalorder %s342_s11, 1  ;;  %s342_s11 = sphi %s363_s11, %s12_s11   ;;  %s338_s10 = sphi %s361_s10, %s396_s10   ;;  %s334_s9 = sphi %s359_s9, %s395_s9  }
   0x3   : > { %p26_p1 = scmp.ge.s32.totalorder %s24_s12, 4  ;;  %p138_p2 = scmp.lt.s32.totalorder %s342_s11, 5 }
   0x5   : > { %s398_s12 = smov (%p26_p1, %s24_s12), 0  ;;  %p139_p3 = pnand %p291_p0, %p138_p2 }
   0x6   : > { %p167_p4 = scmp.lt.s32.totalorder (!%p139_p3), %s334_s9, 3 }
   0x7   : > { %142 = sbr.rel (%p139_p3) target bundleno = 23 (0x17), region = 28 }
   0xc   : > { %v189_v0 = vlaneseq  ;;  %s400_s9 = smov (!%p167_p4, %s334_s9), 3 }
   0xd   : > { %s172_s15 = scalar_lea.vmem %s392_s0, %s400_s9  ;;  %s292_s16 = sshll.u32 %s400_s9, 2 }
   0xe   : > { %v190_v1 = vshrl.u32 %v189_v0, 7  ;;  %s176_s19 = scalar_lea.vmem %s393_s1, %s292_s16  ;;  %v184_v5 = vld [vmem:[%s172_s15] sm:$0x1]  ;;  %s183_s22 = scalar_lea.vmem %s394_s2, %s292_s16 }
   0xf   : > { %v185_v6 = vunpack.c.0.s8 %v184_v5  ;;  %v186_v7 = vld [vmem:[%s176_s19] sm:$0x7] }
  0x10   : > { %v191_v2 = vsub.s32 1, %v190_v1  ;;  %v195_v3 = vsub.s32 2, %v190_v1  ;;  %v200_v4 = vsub.s32 0, %v190_v1 }
  0x11   : > { %vm187_vm0 = vcmp.eq.s32.totalorder %v185_v6, 0  ;;  %vm188_vm1 = vcmp.eq.s32.totalorder %v185_v6, 1 }
  0x12   : > { %v192_v8 = vrot.slane %v186_v7, %v191_v2  ;;  %v196_v9 = vrot.slane %v186_v7, %v195_v3  ;;  %v201_v10 = vrot.slane %v186_v7, %v200_v4 }
  0x14   : > { %v197_v11 = vsel %vm188_vm1, %v192_v8, %v196_v9 }
  0x15   : > { %v202_v12 = vsel %vm187_vm0, %v201_v10, %v197_v11 }
  0x16   : > { %203 = vst [vmem:[%s183_s22] sm:$0xf] %v202_v12 }
  0x17 PF: > { %s12_s11 = sadd.s32 1, %s342_s11   ;;  %s395_s9 = smov %s338_s10 }
  0x18   : > { %p9_p5 = scmp.ge.s32.totalorder %s12_s11, 6   ;;  %s396_s10 = smov %s398_s12 }
  0x1a   :  { %11 = sbr.rel (!%p9_p5) target bundleno = 2 (0x2), region = 61 }

</bundles_post_ra>
